<compile_context>
chip_gen: v7x
topology: tpu7x:2x2x1
jax: 0.10.0
libtpu: 0.0.40
codegen_flags: <defaults>
</compile_context>

<pallas_src>
import functools

import jax
import jax.numpy as jnp
from jax.experimental import pallas as pl
from jax.experimental.pallas import tpu as pltpu


def senet_kernel(x_ref, w1t_ref, w2t_ref, o_ref, *, inv_hw):
    # x_ref  : (Bt, C, HWp)   batch tile, spatial axis lane-padded with zeros
    # w1t_ref: (C, hidden)    fc1 weight, pre-transposed (in x out)
    # w2t_ref: (hidden, C)    fc2 weight, pre-transposed (in x out)
    # o_ref  : (Bt, C, HWp)
    x = x_ref[...]
    xf = x.astype(jnp.float32)

    # Global average pool over the spatial lane axis.  Zero padding does not
    # perturb the sum; divide by the TRUE H*W, not the padded lane count.
    pooled = jnp.sum(xf, axis=-1) * inv_hw                              # (Bt, C)

    # fc1 + ReLU, batched over Bt -> (Bt, hidden)
    h = jnp.dot(pooled, w1t_ref[...], preferred_element_type=jnp.float32)
    h = jnp.maximum(h, 0.0)

    # fc2 + Sigmoid -> (Bt, C)
    s = jnp.dot(h, w2t_ref[...], preferred_element_type=jnp.float32)
    s = jax.nn.sigmoid(s)

    # Channel-wise rescale, broadcast over the (padded) spatial lane axis.
    o_ref[...] = (xf * s[:, :, None]).astype(o_ref.dtype)


def _pick_batch_tile(batch, slab_bytes, vmem_budget_bytes, target_block_bytes):
    """Largest divisor of `batch` whose double-buffered in+out footprint fits
    the VMEM budget, preferring >= 2 grid steps (pipeline overlap) and blocks
    no larger than `target_block_bytes`."""
    divisors = [d for d in range(1, batch + 1) if batch % d == 0]
    fits = [d for d in divisors if 4 * d * slab_bytes <= vmem_budget_bytes] or [1]
    deep = [d for d in fits if batch // d >= 2] or fits
    under = [d for d in deep if d * slab_bytes <= target_block_bytes]
    return max(under) if under else min(deep)


def senet_forward(x, w1, w2, *, stream_dtype=None):
    """x: (B, C, H, W); w1: (C//r, C); w2: (C, C//r) (PyTorch Linear layout).

    stream_dtype=jnp.bfloat16 halves HBM traffic for this bandwidth-bound
    kernel; the pooling / FC math always stays in f32.  Default keeps the
    input dtype so results match the PyTorch module bit-for-bit in f32.
    """
    B, C, H, W = x.shape
    hidden = w1.shape[0]
    HW = H * W
    HWp = ((HW + 127) // 128) * 128          # lane-dense last dim

    io_dtype = x.dtype if stream_dtype is None else stream_dtype
    x_flat = x.reshape(B, C, HW).astype(io_dtype)
    if HWp != HW:
        x_flat = jnp.pad(x_flat, ((0, 0), (0, 0), (0, HWp - HW)))

    # Pre-transpose the weights once so both contraction outputs land on lanes.
    w1t = w1.T.astype(jnp.float32)           # (C, hidden)
    w2t = w2.T.astype(jnp.float32)           # (hidden, C)

    itemsize = jnp.dtype(io_dtype).itemsize
    slab_bytes = C * HWp * itemsize          # one batch element, padded
    vmem_budget = 40 << 20                   # conservative across v5e/v6e/v7x
    Bt = _pick_batch_tile(B, slab_bytes, vmem_budget, target_block_bytes=4 << 20)
    grid = (B // Bt,)

    weight_bytes = 2 * C * hidden * 4
    vmem_need = 4 * Bt * slab_bytes + 2 * weight_bytes
    vmem_limit = int(min(56 << 20, max(2 * vmem_need, 16 << 20)))

    cost = pl.CostEstimate(
        flops=2 * B * C * HW + 4 * B * C * hidden,
        transcendentals=B * C,
        bytes_accessed=2 * B * C * HW * itemsize + weight_bytes,
    )

    kernel = functools.partial(senet_kernel, inv_hw=1.0 / float(HW))

    out_flat = pl.pallas_call(
        kernel,
        out_shape=jax.ShapeDtypeStruct((B, C, HWp), io_dtype),
        grid_spec=pltpu.PrefetchScalarGridSpec(
            num_scalar_prefetch=0,
            grid=grid,
            in_specs=[
                pl.BlockSpec((Bt, C, HWp), lambda b: (b, 0, 0)),
                pl.BlockSpec((C, hidden), lambda b: (0, 0)),
                pl.BlockSpec((hidden, C), lambda b: (0, 0)),
            ],
            out_specs=pl.BlockSpec((Bt, C, HWp), lambda b: (b, 0, 0)),
        ),
        compiler_params=pltpu.CompilerParams(
            dimension_semantics=("parallel",),
            vmem_limit_bytes=vmem_limit,
        ),
        cost_estimate=cost,
    )(x_flat, w1t, w2t)

    return out_flat[..., :HW].reshape(B, C, H, W)


def senet_reference(x, w1, w2):
    """Pure-JAX reference mirroring the PyTorch module."""
    y = jnp.mean(x.astype(jnp.float32), axis=(2, 3))   # (B, C)
    y = jnp.maximum(y @ w1.T, 0.0)                     # (B, C//r)
    y = jax.nn.sigmoid(y @ w2.T)                       # (B, C)
    return x * y[:, :, None, None].astype(x.dtype)


def _check(B, C, H, W, ratio, key):
    hidden = max(C // ratio, 1)
    kx, k1, k2 = jax.random.split(key, 3)
    x = jax.random.normal(kx, (B, C, H, W), dtype=jnp.float32)
    w1 = jax.random.normal(k1, (hidden, C), dtype=jnp.float32) * 0.1
    w2 = jax.random.normal(k2, (C, hidden), dtype=jnp.float32) * 0.1

    out = jax.block_until_ready(senet_forward(x, w1, w2))
    ref = senet_reference(x, w1, w2)
    if not jnp.allclose(out, ref, atol=1e-5, rtol=1e-5):
        raise AssertionError(
            f"Pallas SENet output does not match reference for shape {(B, C, H, W)}"
        )


if __name__ == "__main__":
    key = jax.random.PRNGKey(0)
    k_a, k_b = jax.random.split(key)

    # Primary check: HW already a multiple of 128 (no padding path).
    _check(B=4, C=32, H=16, W=16, ratio=16, key=k_a)
    # Secondary check: ResNet-like 7x7 spatial -> exercises lane padding and
    # the true-HW pooling divisor.
    _check(B=2, C=32, H=7, W=7, ratio=16, key=k_b)

    print("KERNEL_OK")
</pallas_src>

<mosaic_0001>
module attributes {stable_mosaic.version = 11 : i64} {
  func.func @senet_kernel(%arg0: i32, %arg1: memref<2x32x256xf32, #tpu.memory_space<vmem>>, %arg2: memref<32x2xf32, #tpu.memory_space<vmem>>, %arg3: memref<2x32xf32, #tpu.memory_space<vmem>>, %arg4: memref<2x32x256xf32, #tpu.memory_space<vmem>>) attributes {dimension_semantics = [#tpu.dimension_semantics<parallel>], iteration_bounds = array<i64: 2>, scalar_prefetch = 0 : i64, scratch_operands = 0 : i64, tpu.core_type = #tpu.core_type<tc>, window_params = [{transform_indices = @transform_0, window_bounds = array<i64: 2, 32, 256>}, {pipeline_mode = #tpu.pipeline_mode<synchronous>, transform_indices = @transform_1, window_bounds = array<i64: 32, 2>}, {pipeline_mode = #tpu.pipeline_mode<synchronous>, transform_indices = @transform_2, window_bounds = array<i64: 2, 32>}, {transform_indices = @transform_3, window_bounds = array<i64: 2, 32, 256>}]} {
    %c0 = arith.constant 0 : index
    %c0_0 = arith.constant 0 : index
    %c0_1 = arith.constant 0 : index
    %0 = vector.load %arg1[%c0, %c0_0, %c0_1] : memref<2x32x256xf32, #tpu.memory_space<vmem>>, vector<2x32x256xf32>
    %cst = arith.constant dense<0.000000e+00> : vector<2x32xf32>
    %1 = vector.multi_reduction <add>, %0, %cst [2] : vector<2x32x256xf32> to vector<2x32xf32>
    %cst_2 = arith.constant 3.906250e-03 : f32
    %2 = vector.broadcast %cst_2 : f32 to vector<2x32xf32>
    %3 = arith.mulf %1, %2 : vector<2x32xf32>
    %c0_3 = arith.constant 0 : index
    %c0_4 = arith.constant 0 : index
    %4 = vector.load %arg2[%c0_3, %c0_4] : memref<32x2xf32, #tpu.memory_space<vmem>>, vector<32x2xf32>
    %cst_5 = arith.constant dense<0.000000e+00> : vector<2x2xf32>
    %5 = tpu.matmul %3, %4, %cst_5 {dimension_numbers = #tpu.dot_dimension_numbers<[1], [0], [0], [1], [0, 0, 1, 1], [], []>} : vector<2x32xf32>, vector<32x2xf32>, vector<2x2xf32> -> vector<2x2xf32>
    %cst_6 = arith.constant 0.000000e+00 : f32
    %6 = vector.broadcast %cst_6 : f32 to vector<2x2xf32>
    %7 = arith.maximumf %5, %6 : vector<2x2xf32>
    %c0_7 = arith.constant 0 : index
    %c0_8 = arith.constant 0 : index
    %8 = vector.load %arg3[%c0_7, %c0_8] : memref<2x32xf32, #tpu.memory_space<vmem>>, vector<2x32xf32>
    %cst_9 = arith.constant dense<0.000000e+00> : vector<2x32xf32>
    %9 = tpu.matmul %7, %8, %cst_9 {dimension_numbers = #tpu.dot_dimension_numbers<[1], [0], [0], [1], [0, 0, 1, 1], [], []>} : vector<2x2xf32>, vector<2x32xf32>, vector<2x32xf32> -> vector<2x32xf32>
    %10 = arith.negf %9 : vector<2x32xf32>
    %11 = math.exp %10 : vector<2x32xf32>
    %cst_10 = arith.constant 1.000000e+00 : f32
    %12 = vector.broadcast %cst_10 : f32 to vector<2x32xf32>
    %13 = arith.addf %12, %11 : vector<2x32xf32>
    %14 = arith.divf %12, %13 : vector<2x32xf32>
    %15 = vector.shape_cast %14 : vector<2x32xf32> to vector<2x32x1xf32>
    %16 = vector.broadcast %15 : vector<2x32x1xf32> to vector<2x32x256xf32>
    %17 = arith.mulf %0, %16 : vector<2x32x256xf32>
    %c0_11 = arith.constant 0 : index
    %c0_12 = arith.constant 0 : index
    %c0_13 = arith.constant 0 : index
    %18 = vector.load %arg4[%c0_11, %c0_12, %c0_13] : memref<2x32x256xf32, #tpu.memory_space<vmem>>, vector<2x32x256xf32>
    tpu.vector_store %arg4[%c0_11, %c0_12, %c0_13], %17 {strides = array<i32>} : memref<2x32x256xf32, #tpu.memory_space<vmem>>, vector<2x32x256xf32>,
    return
  }
  func.func @transform_0(%arg0: i32) -> (i32, i32, i32) {
    %c0_i32 = arith.constant 0 : i32
    %c0_i32_0 = arith.constant 0 : i32
    %c0_i32_1 = arith.constant 0 : i32
    return %arg0, %c0_i32, %c0_i32_0 : i32, i32, i32
  }
  func.func @transform_1(%arg0: i32) -> (i32, i32) {
    %c0_i32 = arith.constant 0 : i32
    %c0_i32_0 = arith.constant 0 : i32
    %c0_i32_1 = arith.constant 0 : i32
    return %c0_i32, %c0_i32_0 : i32, i32
  }
  func.func @transform_2(%arg0: i32) -> (i32, i32) {
    %c0_i32 = arith.constant 0 : i32
    %c0_i32_0 = arith.constant 0 : i32
    %c0_i32_1 = arith.constant 0 : i32
    return %c0_i32, %c0_i32_0 : i32, i32
  }
  func.func @transform_3(%arg0: i32) -> (i32, i32, i32) {
    %c0_i32 = arith.constant 0 : i32
    %c0_i32_0 = arith.constant 0 : i32
    %c0_i32_1 = arith.constant 0 : i32
    return %arg0, %c0_i32, %c0_i32_0 : i32, i32, i32
  }
}

</mosaic_0001>

<bundles_post_ra>
// kernel: tpu_custom_call.1
= control target key start
LH: loop header
LB: loop body
LE: loop exit
PB: predicated region body
PF: predicated region fallthrough
CT: control target
= control target key end

     0   :  { %8 = vsyncpa [#allocation3], 0  ;;  %s1118_s0 = inlined_call_operand.hbm [shape: f32[4,32,256], index: 0, kind: input, shape index: {}]   ;;  %s1119_s1 = inlined_call_operand.vmem [shape: f32[32,2], index: 1, kind: input, shape index: {}]   ;;  %s1120_s2 = inlined_call_operand.vmem [shape: f32[2,32], index: 2, kind: input, shape index: {}]   ;;  %s1121_s3 = inlined_call_operand.hbm [shape: f32[4,32,256], index: 3, kind: output, shape index: {}]  }
   0x1   :  { %10 = vsyncpa [#allocation3 + $0x1], 0 }
   0x2   :  { %11 = vsyncpa [#allocation4], 0 }
   0x3   :  { %13 = vsyncpa [#allocation4 + $0x1], 0  ;;  %s854_s12 = smov 0   ;;  %s856_s13 = smov 0  }
   0x4   :  { %s858_s14 = smov 0   ;;  %s860_s15 = smov 0  }
   0x5 LB: > { %s875_s16 = sadd.s32 4294967295, %s823_s15   ;;  %s617_s17 = sadd.s32 4294967294, %s823_s15   ;;  %s823_s15 = sphi %s860_s15, %s1134_s15   ;;  %s819_s14 = sphi %s858_s14, %s1133_s14   ;;  %s815_s13 = sphi %s856_s13, %s1132_s13   ;;  %s811_s12 = sphi %s854_s12, %s1131_s12  }
   0x6   : > { %s879_s18 = sadd.s32 1, %s823_s15   ;;  %s26_s19 = sadd.s32 1, %s819_s14 }
   0x7   : > { %s23_s20 = ssub.s32 %s823_s15, %s879_s18  ;;  %p33_p0 = scmp.ne.s32.totalorder %s819_s14, %s815_s13 }
   0x8   : > { %p24_p1 = scmp.eq.s32.totalorder %s23_s20, 0  ;;  %p34_p2 = scmp.eq.s32.totalorder %s823_s15, 0 }
   0x9   : > { %p39_p3 = scmp.ne.s32.totalorder %s815_s13, %s811_s12  ;;  %p40_p4 = scmp.eq.s32.totalorder %s875_s16, 0 }
   0xa   : > { %s891_s21 = scalar_select %p24_p1, %s819_s14, %s26_s19  }
   0xb   : > { %p893_p5 = por %p34_p2, %p33_p0  ;;  %p897_p6 = por %p40_p4, %p39_p3 }
   0xc   : > { %p105_p7 = scmp.eq.s32.totalorder %s875_s16, 1  ;;  %p111_p8 = scmp.eq.s32.totalorder %s617_s17, 1 }
   0xd   : > { %p682_p10 = scmp.lt.s32.totalorder %s823_s15, 2  ;;  %s137_s26 = sand.u32 1, %s819_s14  }
   0xe   : > { %p904_p11 = por %p105_p7, %p33_p0  ;;  %p908_p12 = por %p111_p8, %p39_p3 }
   0xf   : > { %s638_s27 = sshll.u32 %s823_s15, 11  ;;  %s620_s28 = sshll.u32 %s137_s26, 7 }
  0x10   : > { %s1125_s24 = scalar_select %p904_p11, 1, 0 }
  0x11   : > { %s1126_s25 = scalar_select %p908_p12, 1, 0 }
  0x12   : > { %s917_s4 = scalar_lea.hbm %s1118_s0, %s638_s27  ;;  %s141_s5 = scalar_lea.vmem [#allocation2], %s620_s28 }
  0x13   : > { %s149_s6 = sshll.u32 %s141_s5, 4  ;;  %p921_p13 = pnand %p682_p10, %p893_p5  ;;  %s925_s6 = int_to_ptr.vmem [resolvable:$true] %s149_s6 }
  0x14   : > { %s927_s8 = scalar_lea.sflag [#allocation3], %s137_s26  ;;  %s727_s9 = scalar_lea.hbm %s917_s4, 2048 }
  0x15   : > { %p728_p0 = scmp.ne.s32.totalorder %s917_s4, %s727_s9  ;;  %p729_p1 = pneg %p921_p13 }
  0x16   : > { %s732_s17 = scalar_lea.hbm %s1118_s0, 4096  ;;  %p733_p4 = scmp.lt.u32.totalorder %s917_s4, %s1118_s0 }
  0x17   : > { %p730_p2 = pnand %p729_p1, %p728_p0  ;;  %p734_p5 = scmp.lt.u32.totalorder %s732_s17, %s727_s9 }
  0x18   : > { %p736_p8 = scmp.lt.u32.totalorder %s727_s9, %s917_s4 }
  0x19   : > { %p731_p3 = pneg %p730_p2  ;;  %p735_p7 = por %p734_p5, %p733_p4 }
  0x1b   : > { %p737_p10 = por %p736_p8, %p735_p7 }
  0x1d   : > { %p738_p9 = pnand %p737_p10, %p731_p3 }
  0x1f   : > { %741 = shalt.err (!%p738_p9)
}
  0x20   : > { %s742_s22 = scalar_lea.vmem %s925_s6, 2048  ;;  %s825_s26 = smov [#allocation2]  }
  0x21   : > { %p743_p0 = scmp.ne.s32.totalorder %s925_s6, %s742_s22  ;;  %s747_s27 = sshll.u32 %s825_s26, 4  ;;  %s748_s27 = int_to_ptr.vmem [resolvable:$false] %s747_s27 }
  0x22   : > { %s749_s28 = scalar_lea.vmem %s748_s27, 4096  ;;  %p750_p11 = scmp.lt.s32.totalorder %s925_s6, %s748_s27 }
  0x23   : > { %p745_p2 = pnand %p743_p0, %p729_p1  ;;  %p751_p4 = scmp.lt.s32.totalorder %s749_s28, %s742_s22 }
  0x25   : > { %p746_p12 = pneg %p745_p2  ;;  %p752_p5 = por %p751_p4, %p750_p11 }
  0x27   : > { %p753_p7 = pnand %p752_p5, %p746_p12 }
  0x29   : > { %756 = shalt.err (!%p753_p7)
}
  0x2a   : > { %s826_s29 = smov 256   ;;  %s827_s30 = smov 16  }
  0x2b   : > { %677 = dma.hbm_to_vmem [thread:$0]  (!%p921_p13), %s917_s4, 2048, %s925_s6, %s927_s8, %s826_s29, %s826_s29, %s827_s30  }
  0x2c   : > { %p624_p9 = scmp.ge.s32.totalorder %s823_s15, 1  ;;  %p157_p1 = scmp.lt.s32.totalorder %s823_s15, 3 }
  0x2e   : > { %p158_p3 = pnand %p624_p9, %p157_p1 }
  0x2f   : > { %s958_s5 = sand.u32 (!%p158_p3), 1, %s815_s13  }
  0x30   : > { %161 = sbr.rel (%p158_p3) target bundleno = 822 (0x336), region = 32  ;;  %s625_s9 = sshll.u32 (!%p158_p3), %s958_s5, 7 }
  0x31   : > { %s164_s10 = scalar_lea.sflag (!%p158_p3), [#allocation3], %s958_s5  ;;  %s167_s11 = scalar_lea.vmem (!%p158_p3), [#allocation2], %s625_s9 }
  0x37   : > { %802 = dma.done.wait (%p897_p6), %s164_s10, 2048  }
  0x38   : > { %804 = vsyncadd (%p897_p6), %s164_s10, 4294965248  ;;  %v968_v0 = vld [vmem:[%s167_s11 + $0x40] sm:$0xff]  ;;  %v970_v1 = vld [vmem:[%s167_s11 + $0x48] sm:$0xff]  ;;  %v828_v27 = vmov 0.0|0.0   ;;  %vm829_vm0 = vmmov 0   ;;  %v830_v31 = vmov 0.0   ;;  %v252_v32 = vlaneseq }
  0x39   : > { %v972_v2 = vld [vmem:[%s167_s11] sm:$0xff]  ;;  %v220_v3 = vadd.f32 %v970_v1, %v968_v0  ;;  %v976_v4 = vld [vmem:[%s167_s11 + $0x8] sm:$0xff]  ;;  %v978_v5 = vld [vmem:[%s167_s11 + $0x50] sm:$0xff]  ;;  %664 = vmatprep.subr.bf16.mxu0 %v828_v27  ;;  %656 = vmatprep.mubr.msk.f32.mxu0 %vm829_vm0, %v830_v31  ;;  %vm263_vm1 = vcmask 130112   ;;  %vm270_vm2 = vcmask 195712   ;;  %vm277_vm3 = vcmask 261312  }
  0x3a   : > { %v980_v6 = vld [vmem:[%s167_s11 + $0x58] sm:$0xff]  ;;  %v208_v7 = vadd.f32 %v976_v4, %v972_v2  ;;  %v984_v8 = vld [vmem:[%s167_s11 + $0x10] sm:$0xff]  ;;  %v992_v12 = vld [vmem:[%s167_s11 + $0x60] sm:$0xff]  ;;  %659 = vmatprep.subr.mxu1 %v830_v31  ;;  %661 = vmatprep.mubr.msk.f32.mxu1 %vm829_vm0, %v830_v31  ;;  %v253_v34 = vand.u32 127, %v252_v32  ;;  %v255_v39 = vshrl.u32 %v252_v32, 7  ;;  %vm298_vm4 = vcmask 1041409  }
  0x3b   : > { %v986_v9 = vld [vmem:[%s167_s11 + $0x18] sm:$0xff]  ;;  %221 = vadd.xlane.f32.xlu1 %v220_v3  ;;  %v223_v10 = vadd.f32 %v980_v6, %v978_v5  ;;  %v994_v13 = vld [vmem:[%s167_s11 + $0x68] sm:$0xff]  ;;  %v996_v14 = vld [vmem:[%s167_s11 + $0x20] sm:$0xff]  ;;  %vm300_vm5 = vcmask 261120   ;;  %vm379_vm6 = vcmask 1041408   ;;  %vm375_vm7 = vcmask 15360  }
  0x3c   : > { %209 = vadd.xlane.f32.xlu0 %v208_v7  ;;  %v211_v11 = vadd.f32 %v986_v9, %v984_v8  ;;  %v998_v15 = vld [vmem:[%s167_s11 + $0x28] sm:$0xff]  ;;  %v226_v16 = vadd.f32 %v994_v13, %v992_v12  ;;  %v1004_v18 = vld [vmem:[%s167_s11 + $0x70] sm:$0xff]  ;;  %v1006_v19 = vld [vmem:[%s167_s11 + $0x78] sm:$0xff]  ;;  %v258_v36 = vadd.s32 4294967288, %v253_v34  ;;  %v265_v38 = vadd.s32 4294967280, %v253_v34  ;;  %s1037_s27 = scalar_lea.vmem [#allocation5], %s625_s9 }
  0x3d   : > { %v214_v17 = vadd.f32 %v998_v15, %v996_v14  ;;  %v1008_v20 = vld [vmem:[%s167_s11 + $0x30] sm:$0xff]  ;;  %v1010_v21 = vld [vmem:[%s167_s11 + $0x38] sm:$0xff]  ;;  %v229_v22 = vadd.f32 %v1006_v19, %v1004_v18  ;;  %v240_v24 = vld [vmem:[%s1119_s1] sm:$0xff]  ;;  %v272_v43 = vadd.s32 4294967272, %v253_v34  ;;  %v256_v47 = vsub.s32 %v253_v34, %v255_v39  ;;  %s640_s28 = sshll.u32 %s875_s16, 11  ;;  %s544_s29 = sshll.u32 %s1037_s27, 4  ;;  %s1070_s29 = int_to_ptr.vmem [resolvable:$true] %s544_s29 }
  0x3e   : > { %v217_v23 = vadd.f32 %v1010_v21, %v1008_v20  ;;  %v241_v25 = vld [vmem:[%s1119_s1 + $0x8] sm:$0xff]  ;;  %v242_v28 = vld [vmem:[%s1119_s1 + $0x10] sm:$0xff]  ;;  %v243_v29 = vld [vmem:[%s1119_s1 + $0x18] sm:$0xff]  ;;  %v261_v41 = vsub.s32 %v258_v36, %v255_v39  ;;  %v268_v45 = vsub.s32 %v265_v38, %v255_v39  ;;  %v461_v34 = vsub.s32 0, %v255_v39  ;;  %s1068_s10 = scalar_lea.hbm %s1121_s3, %s640_s28  ;;  %s530_s16 = scalar_lea.sflag [#allocation4], %s958_s5 }
  0x3f   : > { %224 = vadd.xlane.f32.xlu1 %v223_v10  ;;  %v665_v26 = vpack.c.bf16 %v241_v25, %v240_v24  ;;  %v668_v30 = vpack.c.bf16 %v243_v29, %v242_v28  ;;  %v275_v54 = vsub.s32 %v272_v43, %v255_v39  ;;  %v374_v25 = vld [vmem:[%s1120_s2] sm:$0x3]  ;;  %s757_s11 = scalar_lea.vmem %s1070_s29, 2048  ;;  %p1128_p11 = scmp.ne.s32.totalorder %s1125_s24, 0 }
  0x40   : > { %212 = vadd.xlane.f32.xlu0 %v211_v11  ;;  %660 = vmatpush3.msk.msra.mxu1 %vm379_vm6, %v374_v25  ;;  %p758_p6 = scmp.ne.s32.totalorder %s1070_s29, %s757_s11  ;;  %s831_s23 = smov [#allocation5]  }
  0x41   : > { %666 = vmatpush3.bf16.msra.mxu0 %v665_v26  ;;  %s761_s4 = sshll.u32 %s831_s23, 4  ;;  %s762_s4 = int_to_ptr.vmem [resolvable:$false] %s761_s4 }
  0x42   : > { %667 = vmatprep.subr.bf16.mxu0 %v828_v27  ;;  %p759_p12 = pnand %p758_p6, %p1128_p11  ;;  %s763_s6 = scalar_lea.vmem %s762_s4, 4096 }
  0x43   : > { %227 = vadd.xlane.f32.xlu1 %v226_v16  ;;  %p764_p8 = scmp.lt.s32.totalorder %s1070_s29, %s762_s4  ;;  %p765_p10 = scmp.lt.s32.totalorder %s763_s6, %s757_s11 }
  0x44   : > { %215 = vadd.xlane.f32.xlu0 %v214_v17  ;;  %p760_p13 = pneg %p759_p12 }
  0x45   : > { %669 = vmatpush3.bf16.msra.mxu0 %v668_v30  ;;  %p766_p0 = por %p765_p10, %p764_p8 }
  0x47   : > { %230 = vadd.xlane.f32.xlu1 %v229_v22  ;;  %p767_p2 = pnand %p766_p0, %p760_p13 }
  0x48   : > { %218 = vadd.xlane.f32.xlu0 %v217_v23 }
  0xc8   : > { %v222_v33 = vpop.xlane.xlu1 %221 }
  0xc9   : > { %v210_v35 = vpop.xlane.xlu0 %209  ;;  %v236_v48 = vmul.f32 0.00390625, %v222_v33 }
  0xca   : > { %v232_v51 = vmul.f32 0.00390625, %v210_v35 }
  0xcb   : > { %v282_v58 = vrot.slane %v236_v48, %v256_v47 }
  0xcc   : > { %v225_v37 = vpop.xlane.xlu1 %224  ;;  %v257_v62 = vrot.slane %v232_v51, %v256_v47 }
  0xcd   : > { %v213_v40 = vpop.xlane.xlu0 %212  ;;  %v237_v42 = vmul.f32 0.00390625, %v225_v37  ;;  %v480_v37 = vsub.s32 1, %v255_v39 }
  0xce   : > { %v233_v44 = vmul.f32 0.00390625, %v213_v40 }
  0xcf   : > { %v286_v53 = vrot.slane %v237_v42, %v261_v41 }
  0xd0   : > { %v228_v46 = vpop.xlane.xlu1 %227  ;;  %v262_v55 = vrot.slane %v233_v44, %v261_v41 }
  0xd1   : > { %v238_v49 = vmul.f32 0.00390625, %v228_v46  ;;  %v216_v50 = vpop.xlane.xlu0 %215  ;;  %v287_v3 = vsel %vm263_vm1, %v286_v53, %v282_v58 }
  0xd2   : > { %v234_v52 = vmul.f32 0.00390625, %v216_v50  ;;  %v264_v10 = vsel %vm263_vm1, %v262_v55, %v257_v62 }
  0xd3   : > { %v291_v56 = vrot.slane %v238_v49, %v268_v45 }
  0xd4   : > { %v231_v57 = vpop.xlane.xlu1 %230  ;;  %v269_v59 = vrot.slane %v234_v52, %v268_v45 }
  0xd5   : > { %v239_v60 = vmul.f32 0.00390625, %v231_v57  ;;  %v219_v61 = vpop.xlane.xlu0 %218  ;;  %v292_v11 = vsel %vm270_vm2, %v291_v56, %v287_v3 }
  0xd6   : > { %v235_v63 = vmul.f32 0.00390625, %v219_v61  ;;  %v271_v17 = vsel %vm270_vm2, %v269_v59, %v264_v10 }
  0xd7   : > { %v296_v7 = vrot.slane %v239_v60, %v275_v54 }
  0xd8   : > { %v276_v16 = vrot.slane %v235_v63, %v275_v54 }
  0xd9   : > { %v297_v22 = vsel %vm277_vm3, %v296_v7, %v292_v11 }
  0xda   : > { %v278_v23 = vsel %vm277_vm3, %v276_v16, %v271_v17 }
  0xdb   : > { %v299_v24 = vsel %vm298_vm4, %v297_v22, %v278_v23 }
  0xdc   : > { %657 = vmatmul.mubr.msk.f32.vlgmr.msra.gmra.mrb[0].mxu0 %vm300_vm5, %v299_v24 }
 0x1af   : > { %v369_v26 = vpop.f32.mrb[0].mxu0 }
 0x1b0   : > { %v373_v27 = vmax.f32 %v369_v26, 0.0  ;;  %v658_v28 = vpop.f32.mrb[1].mxu0 }
 0x1b2   : > { %662 = vmatmul.mubr.msk.f32.vlgmr.msra.gmra.mrb[0].mxu1 %vm375_vm7, %v373_v27 }
 0x285   : > { %v449_v29 = vpop.f32.mrb[0].mxu1 }
 0x286   : > { %v630_v30 = vmul.f32 -1.442695, %v449_v29  ;;  %v663_v31 = vpop.f32.mrb[1].mxu1 }
 0x288   : > { %723 = vpow2.f32 %v630_v30 }
 0x292   : > { %v724_v32 = vpop.eup %723 }
 0x293   : > { %v456_v33 = vadd.f32 1.0, %v724_v32 }
 0x295   : > { %725 = vrcp.f32 %v456_v33 }
 0x29f   : > { %v726_v35 = vpop.eup %725 }
 0x2a0   : > { %v462_v36 = vrot.slane %v726_v35, %v461_v34  ;;  %v481_v38 = vrot.slane %v726_v35, %v480_v37 }
 0x2a2   : > { %468 = vbcast.lane.b32.xlu1 %v462_v36, 264  ;;  %464 = vbcast.lane.b32.xlu0 %v462_v36, 256 }
 0x2a6   : > { %472 = vbcast.lane.b32.xlu1 %v462_v36, 272  ;;  %483 = vbcast.lane.b32.xlu0 %v481_v38, 256 }
 0x2aa   : > { %476 = vbcast.lane.b32.xlu1 %v462_v36, 280  ;;  %491 = vbcast.lane.b32.xlu0 %v481_v38, 272 }
 0x2ae   : > { %487 = vbcast.lane.b32.xlu1 %v481_v38, 264 }
 0x2b2   : > { %495 = vbcast.lane.b32.xlu1 %v481_v38, 280 }
 0x314   : > { %v469_v40 = vpop.permute.xlu1 %468  ;;  %v465_v41 = vpop.permute.xlu0 %464 }
 0x315   : > { %v499_v42 = vmul.f32 %v469_v40, %v984_v8  ;;  %v500_v43 = vmul.f32 %v469_v40, %v986_v9  ;;  %v497_v44 = vmul.f32 %v465_v41, %v972_v2  ;;  %v498_v39 = vmul.f32 %v465_v41, %v976_v4 }
 0x317   : > { %515 = vst [vmem:[%s1037_s27 + $0x10] sm:$0xff] %v499_v42  ;;  %516 = vst [vmem:[%s1037_s27 + $0x18] sm:$0xff] %v500_v43 }
 0x318   : > { %513 = vst [vmem:[%s1037_s27] sm:$0xff] %v497_v44  ;;  %514 = vst [vmem:[%s1037_s27 + $0x8] sm:$0xff] %v498_v39  ;;  %v473_v8 = vpop.permute.xlu1 %472  ;;  %v484_v2 = vpop.permute.xlu0 %483 }
 0x319   : > { %v501_v4 = vmul.f32 %v473_v8, %v996_v14  ;;  %v502_v9 = vmul.f32 %v473_v8, %v998_v15  ;;  %v505_v45 = vmul.f32 %v484_v2, %v968_v0  ;;  %v506_v46 = vmul.f32 %v484_v2, %v970_v1 }
 0x31b   : > { %517 = vst [vmem:[%s1037_s27 + $0x20] sm:$0xff] %v501_v4  ;;  %518 = vst [vmem:[%s1037_s27 + $0x28] sm:$0xff] %v502_v9 }
 0x31c   : > { %521 = vst [vmem:[%s1037_s27 + $0x40] sm:$0xff] %v505_v45  ;;  %522 = vst [vmem:[%s1037_s27 + $0x48] sm:$0xff] %v506_v46  ;;  %v477_v47 = vpop.permute.xlu1 %476  ;;  %v492_v48 = vpop.permute.xlu0 %491 }
 0x31d   : > { %v503_v14 = vmul.f32 %v477_v47, %v1008_v20  ;;  %v504_v49 = vmul.f32 %v477_v47, %v1010_v21  ;;  %v509_v15 = vmul.f32 %v492_v48, %v992_v12  ;;  %v510_v0 = vmul.f32 %v492_v48, %v994_v13 }
 0x31f   : > { %519 = vst [vmem:[%s1037_s27 + $0x30] sm:$0xff] %v503_v14  ;;  %520 = vst [vmem:[%s1037_s27 + $0x38] sm:$0xff] %v504_v49 }
 0x320   : > { %525 = vst [vmem:[%s1037_s27 + $0x60] sm:$0xff] %v509_v15  ;;  %526 = vst [vmem:[%s1037_s27 + $0x68] sm:$0xff] %v510_v0  ;;  %v488_v1 = vpop.permute.xlu1 %487 }
 0x321   : > { %v507_v50 = vmul.f32 %v488_v1, %v978_v5  ;;  %v508_v51 = vmul.f32 %v488_v1, %v980_v6 }
 0x323   : > { %523 = vst [vmem:[%s1037_s27 + $0x50] sm:$0xff] %v507_v50  ;;  %524 = vst [vmem:[%s1037_s27 + $0x58] sm:$0xff] %v508_v51 }
 0x324   : > { %v496_v12 = vpop.permute.xlu1 %495 }
 0x325   : > { %v511_v5 = vmul.f32 %v496_v12, %v1004_v18  ;;  %v512_v13 = vmul.f32 %v496_v12, %v1006_v19 }
 0x327   : > { %527 = vst [vmem:[%s1037_s27 + $0x70] sm:$0xff] %v511_v5  ;;  %528 = vst [vmem:[%s1037_s27 + $0x78] sm:$0xff] %v512_v13 }
 0x328   : > { %770 = shalt.err (!%p767_p2)
}
 0x329   : > { %s771_s7 = scalar_lea.hbm %s1068_s10, 2048  ;;  %s775_s19 = scalar_lea.hbm %s1121_s3, 4096 }
 0x32a   : > { %p772_p4 = scmp.ne.s32.totalorder %s1068_s10, %s771_s7  ;;  %p776_p9 = scmp.lt.u32.totalorder %s1068_s10, %s1121_s3 }
 0x32b   : > { %p777_p1 = scmp.lt.u32.totalorder %s775_s19, %s771_s7  ;;  %p779_p6 = scmp.lt.u32.totalorder %s771_s7, %s1068_s10 }
 0x32c   : > { %p773_p5 = pnand %p772_p4, %p1128_p11 }
 0x32d   : > { %p778_p3 = por %p777_p1, %p776_p9 }
 0x32e   : > { %p774_p7 = pneg %p773_p5 }
 0x32f   : > { %p780_p12 = por %p779_p6, %p778_p3 }
 0x331   : > { %p781_p13 = pnand %p780_p12, %p774_p7 }
 0x333   : > { %784 = shalt.err (!%p781_p13)
}
 0x334   : > { %s832_s26 = smov 256   ;;  %s833_s27 = smov 16  }
 0x335   : > { %672 = dma.vmem_to_hbm [thread:$0]  (%p1128_p11), %s1070_s29, 2048, %s1068_s10, %s530_s16, %s832_s26, %s832_s26, %s833_s27  }
 0x336 PF: > { %s559_s28 = sand.u32 1, %s811_s12   ;;  %p1129_p8 = scmp.ne.s32.totalorder %s1126_s25, 0 }
 0x337   : > { %p1130_p10 = scmp.ge.s32.totalorder %s823_s15, 2  ;;  %s560_s30 = scalar_lea.sflag [#allocation4], %s559_s28 }
 0x339   : > { %p679_p0 = pnand %p1130_p10, %p1129_p8 }
 0x33b   : > { %806 = dma.done.wait (!%p679_p0), %s560_s30, 2048  }
 0x33c   : > { %808 = vsyncadd (!%p679_p0), %s560_s30, 4294965248  ;;  %p16_p2 = scmp.ge.s32.totalorder %s879_s18, 4   ;;  %s1131_s12 = smov %s815_s13 }
 0x33d   : > { %s1132_s13 = smov %s819_s14  ;;  %s1133_s14 = smov %s891_s21 }
 0x33e   : > { %s1134_s15 = smov %s879_s18  ;;  %18 = sbr.rel (!%p16_p2) target bundleno = 5 (0x5), region = 77 }
 0x345   :  { %565 = vsyncpa [#allocation3], 1 }
 0x346   :  { %567 = vsyncpa [#allocation3 + $0x1], 1 }
 0x347   :  { %568 = vsyncpa [#allocation4], 1 }
 0x348   :  { %570 = vsyncpa [#allocation4 + $0x1], 1 }

</bundles_post_ra>
